<compile_context>
chip_gen: v6e
topology: v6e:2x2x1
jax: 0.10.0
libtpu: 0.0.40
codegen_flags: <defaults>
</compile_context>

<pallas_src>
import functools

import jax
import jax.numpy as jnp
from jax.experimental import pallas as pl
from jax.experimental.pallas import tpu as pltpu

_LANE = 128
_TARGET_BLOCK_BYTES = 2 * 1024 * 1024      # aim ~2 MiB per input block
_MAX_UNPADDED_BLOCK_BYTES = 8 * 1024 * 1024  # single (1, T, D) block ceiling


def _mvn_global_kernel(x_ref, o_ref, *, norm_mean: bool, norm_var: bool):
    # Block: (Bt, T, TILE_D); normalization reduces over axis 1 (full T resident).
    x = x_ref[...]
    t = x.shape[1]

    # Accumulate reductions in f32; keep the elementwise body in the input
    # dtype (no full-block f32 copy when the input is bf16).
    m = jnp.sum(x, axis=1, keepdims=True, dtype=jnp.float32) * jnp.float32(1.0 / t)
    xc = x - m.astype(x.dtype)
    y = xc if norm_mean else x

    if norm_var:
        # torch.std -> unbiased (N-1) estimator around the mean, clamped at 1e-5.
        ss = jnp.sum(xc * xc, axis=1, keepdims=True, dtype=jnp.float32)
        var = ss * jnp.float32(1.0 / max(t - 1, 1))
        s = jnp.maximum(jnp.sqrt(var), jnp.float32(1e-5))
        # One reciprocal per (row, feature) column + broadcast multiply over T
        # instead of a per-element divide over the whole block.
        inv_s = pl.reciprocal(s, approx=False)
        y = y * inv_s.astype(y.dtype)

    o_ref[...] = y.astype(o_ref.dtype)


def _choose_layout(B, T, D, itemsize):
    """Pick (pad_d, bt, tile_d): lane-dense tiles of ~2 MiB, no HBM pad pass
    when avoidable."""
    if D % _LANE == 0:
        pad_d = D
        tile_d = _LANE
        for cand in (1024, 512, 256, 128):
            if D % cand == 0:
                tile_d = cand
                break
    else:
        # Ragged feature dim: prefer a full-D block (masked lane stores inside
        # the kernel) over a wrapper-side pad+slice (2 extra HBM passes).
        if T * D * itemsize <= _MAX_UNPADDED_BLOCK_BYTES:
            pad_d = D
            tile_d = D
        else:
            pad_d = ((D + _LANE - 1) // _LANE) * _LANE
            tile_d = _LANE
            for cand in (1024, 512, 256, 128):
                if pad_d % cand == 0:
                    tile_d = cand
                    break

    # Pack batch rows until the input block reaches ~2 MiB (keeps the whole
    # double-buffered pipeline comfortably inside every generation's VMEM).
    bytes_per_row = T * tile_d * itemsize
    bt = max(1, min(B, _TARGET_BLOCK_BYTES // max(bytes_per_row, 1)))
    while B % bt != 0:
        bt -= 1
    return pad_d, bt, tile_d


def mean_variance_norm(x, *, norm_mean=True, norm_var=False,
                       left_context=0, right_context=0, dim=1):
    """Pallas implementation of MeanVarianceNorm.forward (global branch)."""
    T = x.shape[dim]
    if not (left_context == 0 and right_context == 0
            or T <= left_context + right_context + 1):
        # TODO(synk): normalize_cumsum (short-time CMVN) branch not implemented.
        raise NotImplementedError("normalize_cumsum branch not implemented")

    if not norm_mean and not norm_var:
        return x

    # Glue: move the normalization axis to position 1, flatten trailing dims.
    xm = jnp.moveaxis(x, dim, 1) if dim != 1 else x
    orig_shape = xm.shape
    B = orig_shape[0]
    Tn = orig_shape[1]
    D = 1
    for s in orig_shape[2:]:
        D *= s
    x3 = xm.reshape(B, Tn, D)

    itemsize = jnp.dtype(x3.dtype).itemsize
    pad_d, bt, tile_d = _choose_layout(B, Tn, D, itemsize)

    if pad_d != D:
        # Padded columns normalize to 0 (mean 0, std clamped to 1e-5) and are
        # sliced off afterwards.
        x3 = jnp.pad(x3, ((0, 0), (0, 0), (0, pad_d - D)))

    # VMEM budget: ~2x in + 2x out (double-buffered) + f32 reduction temps.
    block_bytes = bt * Tn * tile_d * itemsize
    block_f32_bytes = bt * Tn * tile_d * 4
    vmem_budget = 4 * block_bytes + 3 * block_f32_bytes + (2 << 20)
    vmem_limit = int(min(max(vmem_budget, 16 << 20), 40 << 20))

    kernel = functools.partial(_mvn_global_kernel,
                               norm_mean=norm_mean, norm_var=norm_var)

    out3 = pl.pallas_call(
        kernel,
        out_shape=jax.ShapeDtypeStruct((B, Tn, pad_d), x3.dtype),
        grid_spec=pltpu.PrefetchScalarGridSpec(
            num_scalar_prefetch=0,
            grid=(B // bt, pad_d // tile_d),
            in_specs=[pl.BlockSpec((bt, Tn, tile_d), lambda b, d: (b, 0, d))],
            out_specs=pl.BlockSpec((bt, Tn, tile_d), lambda b, d: (b, 0, d)),
        ),
        compiler_params=pltpu.CompilerParams(
            dimension_semantics=("parallel", "parallel"),
            vmem_limit_bytes=vmem_limit),
    )(x3)

    if pad_d != D:
        out3 = out3[:, :, :D]
    out = out3.reshape(orig_shape)
    if dim != 1:
        out = jnp.moveaxis(out, 1, dim)
    return out


def _reference(x, *, norm_mean=True, norm_var=False, dim=1):
    y = x
    if norm_mean:
        y = y - jnp.mean(y, axis=dim, keepdims=True)
    if norm_var:
        s = jnp.maximum(jnp.std(y, axis=dim, keepdims=True, ddof=1), 1e-5)
        y = y / s
    return y


if __name__ == "__main__":
    key = jax.random.PRNGKey(0)
    k1, k2, k3, k4 = jax.random.split(key, 4)

    # Case 1: default module config (norm_mean=True, norm_var=False), feature
    # dim not a multiple of 128 -> exercises the unpadded full-D block path.
    x1 = jax.random.normal(k1, (4, 16, 80), dtype=jnp.float32) * 3.0 + 1.5
    y1 = jax.block_until_ready(mean_variance_norm(x1))
    y1_ref = _reference(x1, norm_mean=True, norm_var=False)
    assert jnp.allclose(y1, y1_ref, atol=1e-5, rtol=1e-5)

    # Case 2: lane-aligned features + variance normalization (tiled lane axis,
    # batch packing).
    x2 = jax.random.normal(k2, (2, 16, 256), dtype=jnp.float32) * 2.0 - 0.7
    y2 = jax.block_until_ready(mean_variance_norm(x2, norm_mean=True, norm_var=True))
    y2_ref = _reference(x2, norm_mean=True, norm_var=True)
    assert jnp.allclose(y2, y2_ref, atol=1e-4, rtol=1e-4)

    # Case 3: variance-only normalization path, ragged feature dim.
    x3 = jax.random.normal(k3, (2, 16, 32), dtype=jnp.float32) * 1.3 + 0.2
    y3 = jax.block_until_ready(mean_variance_norm(x3, norm_mean=False, norm_var=True))
    y3_ref = _reference(x3, norm_mean=False, norm_var=True)
    assert jnp.allclose(y3, y3_ref, atol=1e-4, rtol=1e-4)

    # Case 4: bf16 input, default config (mean removal only).
    x4 = (jax.random.normal(k4, (2, 8, 128), dtype=jnp.float32) * 2.0 + 0.5
          ).astype(jnp.bfloat16)
    y4 = jax.block_until_ready(mean_variance_norm(x4))
    y4_ref = _reference(x4.astype(jnp.float32), norm_mean=True, norm_var=False)
    assert jnp.allclose(y4.astype(jnp.float32), y4_ref, atol=3e-2, rtol=3e-2)

    print("KERNEL_OK")
</pallas_src>

<mosaic_0001>
module attributes {stable_mosaic.version = 11 : i64} {
  func.func @_mvn_global_kernel(%arg0: i32, %arg1: i32, %arg2: memref<4x16x80xf32, #tpu.memory_space<vmem>>, %arg3: memref<4x16x80xf32, #tpu.memory_space<vmem>>) attributes {dimension_semantics = [#tpu.dimension_semantics<parallel>, #tpu.dimension_semantics<parallel>], iteration_bounds = array<i64: 1, 1>, scalar_prefetch = 0 : i64, scratch_operands = 0 : i64, tpu.core_type = #tpu.core_type<tc>, window_params = [{transform_indices = @transform_0, window_bounds = array<i64: 4, 16, 80>}, {transform_indices = @transform_1, window_bounds = array<i64: 4, 16, 80>}]} {
    %c0 = arith.constant 0 : index
    %c0_0 = arith.constant 0 : index
    %c0_1 = arith.constant 0 : index
    %0 = vector.load %arg2[%c0, %c0_0, %c0_1] : memref<4x16x80xf32, #tpu.memory_space<vmem>>, vector<4x16x80xf32>
    %cst = arith.constant dense<0.000000e+00> : vector<4x80xf32>
    %1 = vector.multi_reduction <add>, %0, %cst [1] : vector<4x16x80xf32> to vector<4x80xf32>
    %2 = vector.shape_cast %1 : vector<4x80xf32> to vector<4x1x80xf32>
    %cst_2 = arith.constant 6.250000e-02 : f32
    %3 = vector.broadcast %cst_2 : f32 to vector<4x1x80xf32>
    %4 = arith.mulf %2, %3 : vector<4x1x80xf32>
    %5 = vector.broadcast %4 : vector<4x1x80xf32> to vector<4x16x80xf32>
    %6 = arith.subf %0, %5 : vector<4x16x80xf32>
    %c0_3 = arith.constant 0 : index
    %c0_4 = arith.constant 0 : index
    %c0_5 = arith.constant 0 : index
    %7 = vector.load %arg3[%c0_3, %c0_4, %c0_5] : memref<4x16x80xf32, #tpu.memory_space<vmem>>, vector<4x16x80xf32>
    tpu.vector_store %arg3[%c0_3, %c0_4, %c0_5], %6 {strides = array<i32>} : memref<4x16x80xf32, #tpu.memory_space<vmem>>, vector<4x16x80xf32>,
    return
  }
  func.func @transform_0(%arg0: i32, %arg1: i32) -> (i32, i32, i32) {
    %c0_i32 = arith.constant 0 : i32
    %c0_i32_0 = arith.constant 0 : i32
    return %arg0, %c0_i32, %arg1 : i32, i32, i32
  }
  func.func @transform_1(%arg0: i32, %arg1: i32) -> (i32, i32, i32) {
    %c0_i32 = arith.constant 0 : i32
    %c0_i32_0 = arith.constant 0 : i32
    return %arg0, %c0_i32, %arg1 : i32, i32, i32
  }
}

</mosaic_0001>

<bundles_post_ra>
// kernel: tpu_custom_call.1
= control target key start
LH: loop header
LB: loop body
LE: loop exit
PB: predicated region body
PF: predicated region fallthrough
CT: control target
= control target key end

     0   :  { %6 = vsyncpa [#allocation3], 0  ;;  %s195_s0 = inlined_call_operand.hbm [shape: f32[4,16,80], index: 0, kind: input, shape index: {}]   ;;  %s196_s1 = inlined_call_operand.hbm [shape: f32[4,16,80], index: 1, kind: output, shape index: {}]  }
   0x1   :  { %7 = vsyncpa [#allocation4], 0  ;;  %s153_s6 = smov [#allocation2]  }
   0x2   :  { %s13_s7 = sshll.u32 %s153_s6, 4  ;;  %s14_s7 = int_to_ptr.vmem [resolvable:$true] %s13_s7 }
   0x3   :  { %s117_s8 = scalar_lea.vmem %s14_s7, 1024  ;;  %p122_p1 = scmp.lt.s32.totalorder %s14_s7, %s14_s7 }
   0x4   :  { %p118_p0 = scmp.ne.s32.totalorder %s14_s7, %s117_s8  ;;  %p123_p2 = scmp.lt.s32.totalorder %s117_s8, %s117_s8 }
   0x6   :  { %p124_p3 = por %p123_p2, %p122_p1 }
   0x8   :  { %p125_p4 = pnand %p124_p3, %p118_p0 }
   0xa   :  { %128 = shalt.err (!%p125_p4)
}
   0xb   :  { %s154_s9 = smov 128   ;;  %s155_s10 = smov 8  }
   0xc   :  { %19 = dma.hbm_to_vmem [thread:$0]  %s195_s0, 1024, %s14_s7, [#allocation3], %s154_s9, %s154_s9, %s155_s10  }
   0xd   :  { %149 = dma.done.wait [#allocation3], 1024  }
   0xe   :  { %150 = vsyncadd [#allocation3], 4294966272  ;;  %vm31_vm0 = vcmask 654336   ;;  %v23_v0 = vld [vmem:[#allocation2] sm:$0xff]  ;;  %v24_v1 = vld [vmem:[#allocation2 + $0x8] sm:$0xff]  ;;  %s156_s0 = smov [#allocation5]  }
   0xf   :  { %v25_v2 = vld [vmem:[#allocation2 + $0x10] sm:$0xff]  ;;  %v32_v3 = vsel %vm31_vm0, %v23_v0, 0.0  ;;  %v33_v4 = vsel %vm31_vm0, %v24_v1, 0.0  ;;  %v26_v5 = vld [vmem:[#allocation2 + $0x18] sm:$0xff]  ;;  %v27_v7 = vld [vmem:[#allocation2 + $0x20] sm:$0xff]  ;;  %s93_s13 = sshll.u32 %s156_s0, 4  ;;  %s94_s13 = int_to_ptr.vmem [resolvable:$true] %s93_s13 }
  0x10   :  { %v41_v6 = vsel %vm31_vm0, %v25_v2, 0.0  ;;  %v28_v8 = vld [vmem:[#allocation2 + $0x28] sm:$0xff]  ;;  %v34_v9 = vadd.f32 %v33_v4, %v32_v3  ;;  %v42_v10 = vsel %vm31_vm0, %v26_v5, 0.0  ;;  %v50_v11 = vsel %vm31_vm0, %v27_v7, 0.0  ;;  %v29_v13 = vld [vmem:[#allocation2 + $0x30] sm:$0xff]  ;;  %v30_v14 = vld [vmem:[#allocation2 + $0x38] sm:$0xff]  ;;  %p134_p6 = scmp.lt.s32.totalorder %s94_s13, %s94_s13 }
  0x11   :  { %v51_v12 = vsel %vm31_vm0, %v28_v8, 0.0  ;;  %v43_v15 = vadd.f32 %v42_v10, %v41_v6  ;;  %v59_v17 = vsel %vm31_vm0, %v29_v13, 0.0  ;;  %v60_v18 = vsel %vm31_vm0, %v30_v14, 0.0  ;;  %s129_s14 = scalar_lea.vmem %s94_s13, 1024 }
  0x12   :  { %v52_v16 = vadd.f32 %v51_v12, %v50_v11  ;;  %v35_v19 = vrot.slane %v34_v9, 4  ;;  %v61_v20 = vadd.f32 %v60_v18, %v59_v17  ;;  %p130_p5 = scmp.ne.s32.totalorder %s94_s13, %s129_s14  ;;  %p135_p7 = scmp.lt.s32.totalorder %s129_s14, %s129_s14 }
  0x13   :  { %v44_v21 = vrot.slane %v43_v15, 4 }
  0x14   :  { %v53_v22 = vrot.slane %v52_v16, 4  ;;  %v36_v23 = vadd.f32 %v35_v19, %v34_v9  ;;  %v62_v24 = vrot.slane %v61_v20, 4  ;;  %p136_p8 = por %p135_p7, %p134_p6 }
  0x15   :  { %v45_v25 = vadd.f32 %v44_v21, %v43_v15 }
  0x16   :  { %v54_v26 = vadd.f32 %v53_v22, %v52_v16  ;;  %v37_v27 = vrot.slane %v36_v23, 2  ;;  %v63_v28 = vadd.f32 %v62_v24, %v61_v20  ;;  %p137_p9 = pnand %p136_p8, %p130_p5 }
  0x17   :  { %v46_v29 = vrot.slane %v45_v25, 2 }
  0x18   :  { %v55_v30 = vrot.slane %v54_v26, 2  ;;  %v38_v31 = vadd.f32 %v37_v27, %v36_v23  ;;  %v64_v32 = vrot.slane %v63_v28, 2 }
  0x19   :  { %v47_v33 = vadd.f32 %v46_v29, %v45_v25 }
  0x1a   :  { %v56_v34 = vadd.f32 %v55_v30, %v54_v26  ;;  %v39_v35 = vrot.slane %v38_v31, 1  ;;  %v65_v36 = vadd.f32 %v64_v32, %v63_v28 }
  0x1b   :  { %v48_v37 = vrot.slane %v47_v33, 1 }
  0x1c   :  { %v57_v38 = vrot.slane %v56_v34, 1  ;;  %v40_v39 = vadd.f32 %v39_v35, %v38_v31  ;;  %v66_v40 = vrot.slane %v65_v36, 1 }
  0x1d   :  { %v49_v41 = vadd.f32 %v48_v37, %v47_v33 }
  0x1e   :  { %v58_v42 = vadd.f32 %v57_v38, %v56_v34  ;;  %v68_v43 = vmul.f32 0.0625, %v40_v39  ;;  %v67_v44 = vadd.f32 %v66_v40, %v65_v36 }
  0x1f   :  { %v69_v45 = vmul.f32 0.0625, %v49_v41 }
  0x20   :  { %v70_v46 = vmul.f32 0.0625, %v58_v42  ;;  %v72_v47 = vsub.f32 %v23_v0, %v68_v43  ;;  %v73_v48 = vsub.f32 %v24_v1, %v68_v43  ;;  %v71_v49 = vmul.f32 0.0625, %v67_v44 }
  0x21   :  { %v74_v50 = vsub.f32 %v25_v2, %v69_v45  ;;  %v75_v51 = vsub.f32 %v26_v5, %v69_v45 }
  0x22   :  { %v76_v52 = vsub.f32 %v27_v7, %v70_v46  ;;  %v77_v53 = vsub.f32 %v28_v8, %v70_v46  ;;  %80 = vst.msk [vmem:[#allocation5] sm:$0xff] %vm31_vm0, %v72_v47  ;;  %81 = vst.msk [vmem:[#allocation5 + $0x8] sm:$0xff] %vm31_vm0, %v73_v48  ;;  %v78_v54 = vsub.f32 %v29_v13, %v71_v49 }
  0x23   :  { %v79_v55 = vsub.f32 %v30_v14, %v71_v49  ;;  %82 = vst.msk [vmem:[#allocation5 + $0x10] sm:$0xff] %vm31_vm0, %v74_v50  ;;  %83 = vst.msk [vmem:[#allocation5 + $0x18] sm:$0xff] %vm31_vm0, %v75_v51 }
  0x24   :  { %84 = vst.msk [vmem:[#allocation5 + $0x20] sm:$0xff] %vm31_vm0, %v76_v52  ;;  %85 = vst.msk [vmem:[#allocation5 + $0x28] sm:$0xff] %vm31_vm0, %v77_v53 }
  0x25   :  { %86 = vst.msk [vmem:[#allocation5 + $0x30] sm:$0xff] %vm31_vm0, %v78_v54  ;;  %87 = vst.msk [vmem:[#allocation5 + $0x38] sm:$0xff] %vm31_vm0, %v79_v55 }
  0x26   :  { %140 = shalt.err (!%p137_p9)
}
  0x27   :  { %99 = dma.vmem_to_hbm [thread:$0]  %s94_s13, 1024, %s196_s1, [#allocation4], %s154_s9, %s154_s9, %s155_s10  }
  0x28   :  { %151 = dma.done.wait [#allocation4], 1024  }
  0x29   :  { %152 = vsyncadd [#allocation4], 4294966272 }
  0x2a   :  { %103 = vsyncpa [#allocation3], 1 }
  0x2b   :  { %104 = vsyncpa [#allocation4], 1 }

</bundles_post_ra>
